<compile_context>
chip_gen: v7x
topology: tpu7x:2x2x1
jax: 0.10.0
libtpu: 0.0.40
codegen_flags: <defaults>
</compile_context>

<pallas_src>
import functools

import jax
import jax.numpy as jnp
from jax.experimental import pallas as pl
from jax.experimental.pallas import tpu as pltpu


def _residual_kernel(x_ref, w1_ref, b1_ref, w2_ref, b2_ref, o_ref, stack_ref,
                     *, H, W, C, add):
    """One batch element per grid step.

    x_ref     : (1, C, P)   flattened NCHW image, P = H*W on the lane axis
    wX_ref    : (C, 9*C)    BN-fused conv weight, column = (kh*3 + kw)*C + cin
    bX_ref    : (C, 1)      BN-fused bias
    o_ref     : (1, C, P)
    stack_ref : (9*C, P)    VMEM scratch holding the 9-tap shifted stack
    """
    P = H * W

    # Column masks: only taps with kw != 1 need them (left/right image border).
    # Top/bottom border is handled by the zero extension of the flattened plane.
    col = jax.lax.broadcasted_iota(jnp.int32, (1, P), 1) % W
    not_left = (col != 0).astype(jnp.float32)           # kills reads of column -1
    not_right = (col != (W - 1)).astype(jnp.float32)    # kills reads of column W
    zpad = jnp.zeros((C, W + 1), jnp.float32)

    def conv_bn_silu(x, w, b):
        # Build the 9-tap shifted stack (9*C, P) once, then ONE matmul.
        xp = jnp.concatenate([zpad, x, zpad], axis=1)    # (C, P + 2W + 2)
        for kh in range(3):
            for kw in range(3):
                start = (W + 1) + (kh - 1) * W + (kw - 1)   # static lane offset
                t = xp[:, start:start + P]                  # (C, P)
                if kw == 0:
                    t = t * not_left
                elif kw == 2:
                    t = t * not_right
                tap = kh * 3 + kw
                stack_ref[tap * C:(tap + 1) * C, :] = t
        y = jnp.dot(w, stack_ref[...],
                    preferred_element_type=jnp.float32) + b  # (C, P)
        return y * jax.nn.sigmoid(y)                         # SiLU (EUP)

    x = x_ref[0]                                             # (C, P), lane-dense
    h1 = conv_bn_silu(x, w1_ref[...], b1_ref[...])
    h2 = conv_bn_silu(h1, w2_ref[...], b2_ref[...])
    o_ref[0] = (h2 + x) if add else h2


def _fuse_conv_bn(w, gamma, beta, mean, var, eps=1e-5):
    """Fold BN(running stats) into conv. w: (Cout, Cin, 3, 3) -> (Cout, 9*Cin)."""
    scale = gamma / jnp.sqrt(var + eps)                      # (Cout,)
    w_f = w * scale[:, None, None, None]                     # (Cout, Cin, 3, 3)
    b_f = beta - mean * scale                                # (Cout,)
    cout, cin = w.shape[0], w.shape[1]
    # column index = (kh*3 + kw)*Cin + cin -> matches the kernel's tap-stack order
    w_mat = jnp.transpose(w_f, (0, 2, 3, 1)).reshape(cout, 9 * cin)
    return w_mat.astype(jnp.float32), b_f.reshape(cout, 1).astype(jnp.float32)


def _vmem_limit_bytes(C, P):
    plane = 4 * C * P                           # one f32 (C, H*W) image plane
    stack = 4 * 9 * C * P                       # tap-stack scratch
    weights = 4 * 2 * (9 * C * C + C)
    # double-buffered in/out blocks + weights + stack + temporaries/headroom
    need = 2 * 2 * plane + weights + stack + (8 << 20)
    return min(48 << 20, max(16 << 20, need))   # safe on v5e/v6e/v7x


@functools.partial(jax.jit, static_argnames=("add",))
def qbw_residual(x_nchw, w1_mat, b1, w2_mat, b2, add=True):
    N, C, H, W = x_nchw.shape
    P = H * W
    # Metadata-only reshape: no transpose, no pad, no extra HBM pass.
    x_flat = jnp.reshape(x_nchw.astype(jnp.float32), (N, C, P))

    kernel = functools.partial(_residual_kernel, H=H, W=W, C=C, add=add)

    out_flat = pl.pallas_call(
        kernel,
        out_shape=jax.ShapeDtypeStruct((N, C, P), jnp.float32),
        grid=(N,),
        in_specs=[
            pl.BlockSpec((1, C, P), lambda b: (b, 0, 0)),
            pl.BlockSpec((C, 9 * C), lambda b: (0, 0)),
            pl.BlockSpec((C, 1), lambda b: (0, 0)),
            pl.BlockSpec((C, 9 * C), lambda b: (0, 0)),
            pl.BlockSpec((C, 1), lambda b: (0, 0)),
        ],
        out_specs=pl.BlockSpec((1, C, P), lambda b: (b, 0, 0)),
        scratch_shapes=[pltpu.VMEM((9 * C, P), jnp.float32)],
        compiler_params=pltpu.CompilerParams(
            dimension_semantics=("parallel",),
            vmem_limit_bytes=_vmem_limit_bytes(C, P),
        ),
    )(x_flat, w1_mat, b1, w2_mat, b2)

    return jnp.reshape(out_flat, (N, C, H, W))


def _reference(x_nchw, w1, bn1, w2, bn2, add=True, eps=1e-5):
    """Pure-JAX NCHW reference mirroring the PyTorch forward."""
    def convbn_silu(x, w, bn):
        gamma, beta, mean, var = bn
        y = jax.lax.conv_general_dilated(
            x, w, window_strides=(1, 1), padding=((1, 1), (1, 1)),
            dimension_numbers=('NCHW', 'OIHW', 'NCHW'))
        scale = gamma / jnp.sqrt(var + eps)
        y = y * scale[None, :, None, None] + (beta - mean * scale)[None, :, None, None]
        return y * jax.nn.sigmoid(y)

    y = convbn_silu(x_nchw, w1, bn1)
    y = convbn_silu(y, w2, bn2)
    return y + x_nchw if add else y


if __name__ == "__main__":
    # Small shapes consistent with QBWResidual(ch): batch=2, ch=4, spatial=16x16.
    N, C, H, W = 2, 4, 16, 16

    key = jax.random.PRNGKey(0)
    keys = jax.random.split(key, 11)

    x = jax.random.normal(keys[0], (N, C, H, W), jnp.float32)

    # Deterministic synthetic parameters (conv weight + BN stats) per QBWConv layer.
    def init_layer(kw, kg, kb, km, kv):
        w = jax.random.normal(kw, (C, C, 3, 3), jnp.float32) / jnp.sqrt(9.0 * C)
        gamma = jax.random.uniform(kg, (C,), jnp.float32, 0.5, 1.5)
        beta = 0.1 * jax.random.normal(kb, (C,), jnp.float32)
        mean = 0.1 * jax.random.normal(km, (C,), jnp.float32)
        var = jax.random.uniform(kv, (C,), jnp.float32, 0.5, 1.5)
        return w, (gamma, beta, mean, var)

    w1, bn1 = init_layer(*keys[1:6])
    w2, bn2 = init_layer(*keys[6:11])

    # Fold BN into conv (glue, plain JAX).
    w1_mat, b1 = _fuse_conv_bn(w1, *bn1)
    w2_mat, b2 = _fuse_conv_bn(w2, *bn2)

    out = qbw_residual(x, w1_mat, b1, w2_mat, b2, add=True)
    out = jax.block_until_ready(out)

    ref = _reference(x, w1, bn1, w2, bn2, add=True)
    assert out.shape == (N, C, H, W)
    assert jnp.allclose(out, ref, rtol=1e-4, atol=1e-4), "mismatch vs reference"

    print("KERNEL_OK")
</pallas_src>

<mosaic_0001>
module attributes {stable_mosaic.version = 11 : i64} {
  func.func @_residual_kernel(%arg0: i32, %arg1: memref<1x4x256xf32, #tpu.memory_space<vmem>>, %arg2: memref<4x36xf32, #tpu.memory_space<vmem>>, %arg3: memref<4x1xf32, #tpu.memory_space<vmem>>, %arg4: memref<4x36xf32, #tpu.memory_space<vmem>>, %arg5: memref<4x1xf32, #tpu.memory_space<vmem>>, %arg6: memref<1x4x256xf32, #tpu.memory_space<vmem>>, %arg7: memref<36x256xf32, #tpu.memory_space<vmem>>) attributes {dimension_semantics = [#tpu.dimension_semantics<parallel>], iteration_bounds = array<i64: 2>, scalar_prefetch = 0 : i64, scratch_operands = 1 : i64, tpu.core_type = #tpu.core_type<tc>, window_params = [{transform_indices = @transform_0, window_bounds = array<i64: 1, 4, 256>}, {pipeline_mode = #tpu.pipeline_mode<synchronous>, transform_indices = @transform_1, window_bounds = array<i64: 4, 36>}, {pipeline_mode = #tpu.pipeline_mode<synchronous>, transform_indices = @transform_2, window_bounds = array<i64: 4, 1>}, {pipeline_mode = #tpu.pipeline_mode<synchronous>, transform_indices = @transform_3, window_bounds = array<i64: 4, 36>}, {pipeline_mode = #tpu.pipeline_mode<synchronous>, transform_indices = @transform_4, window_bounds = array<i64: 4, 1>}, {transform_indices = @transform_5, window_bounds = array<i64: 1, 4, 256>}]} {
    %0 = tpu.iota {dimensions = array<i32: 1>} : vector<1x256xi32>
    %c16_i32 = arith.constant 16 : i32
    %c0_i32 = arith.constant 0 : i32
    %1 = arith.cmpi eq, %c16_i32, %c0_i32 : i32
    %c1_i32 = arith.constant 1 : i32
    %2 = arith.select %1, %c1_i32, %c16_i32 : i32
    %3 = vector.broadcast %2 : i32 to vector<1x256xi32>
    %4 = arith.remsi %0, %3 : vector<1x256xi32>
    %c0_i32_0 = arith.constant 0 : i32
    %5 = vector.broadcast %c0_i32_0 : i32 to vector<1x256xi32>
    %6 = arith.cmpi ne, %4, %5 : vector<1x256xi32>
    %c0_i32_1 = arith.constant 0 : i32
    %7 = vector.broadcast %c0_i32_1 : i32 to vector<1x256xi32>
    %8 = arith.cmpi slt, %4, %7 : vector<1x256xi32>
    %c0_i32_2 = arith.constant 0 : i32
    %9 = arith.cmpi slt, %2, %c0_i32_2 : i32
    %10 = vector.broadcast %9 : i1 to vector<1x256xi1>
    %11 = vector.broadcast %10 : vector<1x256xi1> to vector<1x256xi1>
    %12 = arith.xori %8, %11 : vector<1x256xi1>
    %13 = arith.andi %12, %6 : vector<1x256xi1>
    %14 = vector.broadcast %2 : i32 to vector<1x256xi32>
    %15 = arith.addi %4, %14 : vector<1x256xi32>
    %16 = arith.select %13, %15, %4 : vector<1x256xi1>, vector<1x256xi32>
    %c0_i32_3 = arith.constant 0 : i32
    %17 = vector.broadcast %c0_i32_3 : i32 to vector<1x256xi32>
    %18 = arith.cmpi ne, %16, %17 : vector<1x256xi32>
    %19 = arith.extui %18 : vector<1x256xi1> to vector<1x256xi32>
    %20 = arith.sitofp %19 : vector<1x256xi32> to vector<1x256xf32>
    %c15_i32 = arith.constant 15 : i32
    %21 = vector.broadcast %c15_i32 : i32 to vector<1x256xi32>
    %22 = arith.cmpi ne, %16, %21 : vector<1x256xi32>
    %23 = arith.extui %22 : vector<1x256xi1> to vector<1x256xi32>
    %24 = arith.sitofp %23 : vector<1x256xi32> to vector<1x256xf32>
    %cst = arith.constant 0.000000e+00 : f32
    %25 = vector.broadcast %cst : f32 to vector<4x17xf32>
    %c0 = arith.constant 0 : index
    %c0_4 = arith.constant 0 : index
    %c0_5 = arith.constant 0 : index
    %26 = vector.load %arg1[%c0, %c0_4, %c0_5] : memref<1x4x256xf32, #tpu.memory_space<vmem>>, vector<1x4x256xf32>
    %27 = vector.shape_cast %26 : vector<1x4x256xf32> to vector<4x256xf32>
    %c0_6 = arith.constant 0 : index
    %c0_7 = arith.constant 0 : index
    %28 = vector.load %arg2[%c0_6, %c0_7] : memref<4x36xf32, #tpu.memory_space<vmem>>, vector<4x36xf32>
    %c0_8 = arith.constant 0 : index
    %c0_9 = arith.constant 0 : index
    %29 = vector.load %arg3[%c0_8, %c0_9] : memref<4x1xf32, #tpu.memory_space<vmem>>, vector<4x1xf32>
    %30 = tpu.concatenate %25, %27, %25 in 1 : vector<4x17xf32>, vector<4x256xf32>, vector<4x17xf32> -> vector<4x290xf32>
    %31 = vector.extract_strided_slice %30 {offsets = [0, 0], sizes = [4, 256], strides = [1, 1]} : vector<4x290xf32> to vector<4x256xf32>
    %32 = vector.broadcast %20 : vector<1x256xf32> to vector<4x256xf32>
    %33 = arith.mulf %31, %32 : vector<4x256xf32>
    %c0_10 = arith.constant 0 : index
    %c0_11 = arith.constant 0 : index
    %34 = vector.load %arg7[%c0_10, %c0_11] : memref<36x256xf32, #tpu.memory_space<vmem>>, vector<4x256xf32>
    tpu.vector_store %arg7[%c0_10, %c0_11], %33 {strides = array<i32>} : memref<36x256xf32, #tpu.memory_space<vmem>>, vector<4x256xf32>,
    %35 = vector.extract_strided_slice %30 {offsets = [0, 1], sizes = [4, 256], strides = [1, 1]} : vector<4x290xf32> to vector<4x256xf32>
    %c4 = arith.constant 4 : index
    %c0_12 = arith.constant 0 : index
    %36 = vector.load %arg7[%c4, %c0_12] : memref<36x256xf32, #tpu.memory_space<vmem>>, vector<4x256xf32>
    tpu.vector_store %arg7[%c4, %c0_12], %35 {strides = array<i32>} : memref<36x256xf32, #tpu.memory_space<vmem>>, vector<4x256xf32>,
    %37 = vector.extract_strided_slice %30 {offsets = [0, 2], sizes = [4, 256], strides = [1, 1]} : vector<4x290xf32> to vector<4x256xf32>
    %38 = vector.broadcast %24 : vector<1x256xf32> to vector<4x256xf32>
    %39 = arith.mulf %37, %38 : vector<4x256xf32>
    %c8 = arith.constant 8 : index
    %c0_13 = arith.constant 0 : index
    %40 = vector.load %arg7[%c8, %c0_13] : memref<36x256xf32, #tpu.memory_space<vmem>>, vector<4x256xf32>
    tpu.vector_store %arg7[%c8, %c0_13], %39 {strides = array<i32>} : memref<36x256xf32, #tpu.memory_space<vmem>>, vector<4x256xf32>,
    %41 = vector.extract_strided_slice %30 {offsets = [0, 16], sizes = [4, 256], strides = [1, 1]} : vector<4x290xf32> to vector<4x256xf32>
    %42 = vector.broadcast %20 : vector<1x256xf32> to vector<4x256xf32>
    %43 = arith.mulf %41, %42 : vector<4x256xf32>
    %c12 = arith.constant 12 : index
    %c0_14 = arith.constant 0 : index
    %44 = vector.load %arg7[%c12, %c0_14] : memref<36x256xf32, #tpu.memory_space<vmem>>, vector<4x256xf32>
    tpu.vector_store %arg7[%c12, %c0_14], %43 {strides = array<i32>} : memref<36x256xf32, #tpu.memory_space<vmem>>, vector<4x256xf32>,
    %45 = vector.extract_strided_slice %30 {offsets = [0, 17], sizes = [4, 256], strides = [1, 1]} : vector<4x290xf32> to vector<4x256xf32>
    %c16 = arith.constant 16 : index
    %c0_15 = arith.constant 0 : index
    %46 = vector.load %arg7[%c16, %c0_15] : memref<36x256xf32, #tpu.memory_space<vmem>>, vector<4x256xf32>
    tpu.vector_store %arg7[%c16, %c0_15], %45 {strides = array<i32>} : memref<36x256xf32, #tpu.memory_space<vmem>>, vector<4x256xf32>,
    %47 = vector.extract_strided_slice %30 {offsets = [0, 18], sizes = [4, 256], strides = [1, 1]} : vector<4x290xf32> to vector<4x256xf32>
    %48 = vector.broadcast %24 : vector<1x256xf32> to vector<4x256xf32>
    %49 = arith.mulf %47, %48 : vector<4x256xf32>
    %c20 = arith.constant 20 : index
    %c0_16 = arith.constant 0 : index
    %50 = vector.load %arg7[%c20, %c0_16] : memref<36x256xf32, #tpu.memory_space<vmem>>, vector<4x256xf32>
    tpu.vector_store %arg7[%c20, %c0_16], %49 {strides = array<i32>} : memref<36x256xf32, #tpu.memory_space<vmem>>, vector<4x256xf32>,
    %51 = vector.extract_strided_slice %30 {offsets = [0, 32], sizes = [4, 256], strides = [1, 1]} : vector<4x290xf32> to vector<4x256xf32>
    %52 = vector.broadcast %20 : vector<1x256xf32> to vector<4x256xf32>
    %53 = arith.mulf %51, %52 : vector<4x256xf32>
    %c24 = arith.constant 24 : index
    %c0_17 = arith.constant 0 : index
    %54 = vector.load %arg7[%c24, %c0_17] : memref<36x256xf32, #tpu.memory_space<vmem>>, vector<4x256xf32>
    tpu.vector_store %arg7[%c24, %c0_17], %53 {strides = array<i32>} : memref<36x256xf32, #tpu.memory_space<vmem>>, vector<4x256xf32>,
    %55 = vector.extract_strided_slice %30 {offsets = [0, 33], sizes = [4, 256], strides = [1, 1]} : vector<4x290xf32> to vector<4x256xf32>
    %c28 = arith.constant 28 : index
    %c0_18 = arith.constant 0 : index
    %56 = vector.load %arg7[%c28, %c0_18] : memref<36x256xf32, #tpu.memory_space<vmem>>, vector<4x256xf32>
    tpu.vector_store %arg7[%c28, %c0_18], %55 {strides = array<i32>} : memref<36x256xf32, #tpu.memory_space<vmem>>, vector<4x256xf32>,
    %57 = vector.extract_strided_slice %30 {offsets = [0, 34], sizes = [4, 256], strides = [1, 1]} : vector<4x290xf32> to vector<4x256xf32>
    %58 = vector.broadcast %24 : vector<1x256xf32> to vector<4x256xf32>
    %59 = arith.mulf %57, %58 : vector<4x256xf32>
    %c32 = arith.constant 32 : index
    %c0_19 = arith.constant 0 : index
    %60 = vector.load %arg7[%c32, %c0_19] : memref<36x256xf32, #tpu.memory_space<vmem>>, vector<4x256xf32>
    tpu.vector_store %arg7[%c32, %c0_19], %59 {strides = array<i32>} : memref<36x256xf32, #tpu.memory_space<vmem>>, vector<4x256xf32>,
    %c0_20 = arith.constant 0 : index
    %c0_21 = arith.constant 0 : index
    %61 = vector.load %arg7[%c0_20, %c0_21] : memref<36x256xf32, #tpu.memory_space<vmem>>, vector<36x256xf32>
    %cst_22 = arith.constant dense<0.000000e+00> : vector<4x256xf32>
    %62 = tpu.matmul %28, %61, %cst_22 {dimension_numbers = #tpu.dot_dimension_numbers<[1], [0], [0], [1], [0, 0, 1, 1], [], []>} : vector<4x36xf32>, vector<36x256xf32>, vector<4x256xf32> -> vector<4x256xf32>
    %63 = vector.broadcast %29 : vector<4x1xf32> to vector<4x256xf32>
    %64 = arith.addf %62, %63 : vector<4x256xf32>
    %65 = arith.negf %64 : vector<4x256xf32>
    %66 = math.exp %65 : vector<4x256xf32>
    %cst_23 = arith.constant 1.000000e+00 : f32
    %67 = vector.broadcast %cst_23 : f32 to vector<4x256xf32>
    %68 = arith.addf %67, %66 : vector<4x256xf32>
    %69 = arith.divf %67, %68 : vector<4x256xf32>
    %70 = arith.mulf %64, %69 : vector<4x256xf32>
    %c0_24 = arith.constant 0 : index
    %c0_25 = arith.constant 0 : index
    %71 = vector.load %arg4[%c0_24, %c0_25] : memref<4x36xf32, #tpu.memory_space<vmem>>, vector<4x36xf32>
    %c0_26 = arith.constant 0 : index
    %c0_27 = arith.constant 0 : index
    %72 = vector.load %arg5[%c0_26, %c0_27] : memref<4x1xf32, #tpu.memory_space<vmem>>, vector<4x1xf32>
    %73 = tpu.concatenate %25, %70, %25 in 1 : vector<4x17xf32>, vector<4x256xf32>, vector<4x17xf32> -> vector<4x290xf32>
    %74 = vector.extract_strided_slice %73 {offsets = [0, 0], sizes = [4, 256], strides = [1, 1]} : vector<4x290xf32> to vector<4x256xf32>
    %75 = vector.broadcast %20 : vector<1x256xf32> to vector<4x256xf32>
    %76 = arith.mulf %74, %75 : vector<4x256xf32>
    %c0_28 = arith.constant 0 : index
    %c0_29 = arith.constant 0 : index
    %77 = vector.load %arg7[%c0_28, %c0_29] : memref<36x256xf32, #tpu.memory_space<vmem>>, vector<4x256xf32>
    tpu.vector_store %arg7[%c0_28, %c0_29], %76 {strides = array<i32>} : memref<36x256xf32, #tpu.memory_space<vmem>>, vector<4x256xf32>,
    %78 = vector.extract_strided_slice %73 {offsets = [0, 1], sizes = [4, 256], strides = [1, 1]} : vector<4x290xf32> to vector<4x256xf32>
    %c4_30 = arith.constant 4 : index
    %c0_31 = arith.constant 0 : index
    %79 = vector.load %arg7[%c4_30, %c0_31] : memref<36x256xf32, #tpu.memory_space<vmem>>, vector<4x256xf32>
    tpu.vector_store %arg7[%c4_30, %c0_31], %78 {strides = array<i32>} : memref<36x256xf32, #tpu.memory_space<vmem>>, vector<4x256xf32>,
    %80 = vector.extract_strided_slice %73 {offsets = [0, 2], sizes = [4, 256], strides = [1, 1]} : vector<4x290xf32> to vector<4x256xf32>
    %81 = vector.broadcast %24 : vector<1x256xf32> to vector<4x256xf32>
    %82 = arith.mulf %80, %81 : vector<4x256xf32>
    %c8_32 = arith.constant 8 : index
    %c0_33 = arith.constant 0 : index
    %83 = vector.load %arg7[%c8_32, %c0_33] : memref<36x256xf32, #tpu.memory_space<vmem>>, vector<4x256xf32>
    tpu.vector_store %arg7[%c8_32, %c0_33], %82 {strides = array<i32>} : memref<36x256xf32, #tpu.memory_space<vmem>>, vector<4x256xf32>,
    %84 = vector.extract_strided_slice %73 {offsets = [0, 16], sizes = [4, 256], strides = [1, 1]} : vector<4x290xf32> to vector<4x256xf32>
    %85 = vector.broadcast %20 : vector<1x256xf32> to vector<4x256xf32>
    %86 = arith.mulf %84, %85 : vector<4x256xf32>
    %c12_34 = arith.constant 12 : index
    %c0_35 = arith.constant 0 : index
    %87 = vector.load %arg7[%c12_34, %c0_35] : memref<36x256xf32, #tpu.memory_space<vmem>>, vector<4x256xf32>
    tpu.vector_store %arg7[%c12_34, %c0_35], %86 {strides = array<i32>} : memref<36x256xf32, #tpu.memory_space<vmem>>, vector<4x256xf32>,
    %88 = vector.extract_strided_slice %73 {offsets = [0, 17], sizes = [4, 256], strides = [1, 1]} : vector<4x290xf32> to vector<4x256xf32>
    %c16_36 = arith.constant 16 : index
    %c0_37 = arith.constant 0 : index
    %89 = vector.load %arg7[%c16_36, %c0_37] : memref<36x256xf32, #tpu.memory_space<vmem>>, vector<4x256xf32>
    tpu.vector_store %arg7[%c16_36, %c0_37], %88 {strides = array<i32>} : memref<36x256xf32, #tpu.memory_space<vmem>>, vector<4x256xf32>,
    %90 = vector.extract_strided_slice %73 {offsets = [0, 18], sizes = [4, 256], strides = [1, 1]} : vector<4x290xf32> to vector<4x256xf32>
    %91 = vector.broadcast %24 : vector<1x256xf32> to vector<4x256xf32>
    %92 = arith.mulf %90, %91 : vector<4x256xf32>
    %c20_38 = arith.constant 20 : index
    %c0_39 = arith.constant 0 : index
    %93 = vector.load %arg7[%c20_38, %c0_39] : memref<36x256xf32, #tpu.memory_space<vmem>>, vector<4x256xf32>
    tpu.vector_store %arg7[%c20_38, %c0_39], %92 {strides = array<i32>} : memref<36x256xf32, #tpu.memory_space<vmem>>, vector<4x256xf32>,
    %94 = vector.extract_strided_slice %73 {offsets = [0, 32], sizes = [4, 256], strides = [1, 1]} : vector<4x290xf32> to vector<4x256xf32>
    %95 = vector.broadcast %20 : vector<1x256xf32> to vector<4x256xf32>
    %96 = arith.mulf %94, %95 : vector<4x256xf32>
    %c24_40 = arith.constant 24 : index
    %c0_41 = arith.constant 0 : index
    %97 = vector.load %arg7[%c24_40, %c0_41] : memref<36x256xf32, #tpu.memory_space<vmem>>, vector<4x256xf32>
    tpu.vector_store %arg7[%c24_40, %c0_41], %96 {strides = array<i32>} : memref<36x256xf32, #tpu.memory_space<vmem>>, vector<4x256xf32>,
    %98 = vector.extract_strided_slice %73 {offsets = [0, 33], sizes = [4, 256], strides = [1, 1]} : vector<4x290xf32> to vector<4x256xf32>
    %c28_42 = arith.constant 28 : index
    %c0_43 = arith.constant 0 : index
    %99 = vector.load %arg7[%c28_42, %c0_43] : memref<36x256xf32, #tpu.memory_space<vmem>>, vector<4x256xf32>
    tpu.vector_store %arg7[%c28_42, %c0_43], %98 {strides = array<i32>} : memref<36x256xf32, #tpu.memory_space<vmem>>, vector<4x256xf32>,
    %100 = vector.extract_strided_slice %73 {offsets = [0, 34], sizes = [4, 256], strides = [1, 1]} : vector<4x290xf32> to vector<4x256xf32>
    %101 = vector.broadcast %24 : vector<1x256xf32> to vector<4x256xf32>
    %102 = arith.mulf %100, %101 : vector<4x256xf32>
    %c32_44 = arith.constant 32 : index
    %c0_45 = arith.constant 0 : index
    %103 = vector.load %arg7[%c32_44, %c0_45] : memref<36x256xf32, #tpu.memory_space<vmem>>, vector<4x256xf32>
    tpu.vector_store %arg7[%c32_44, %c0_45], %102 {strides = array<i32>} : memref<36x256xf32, #tpu.memory_space<vmem>>, vector<4x256xf32>,
    %c0_46 = arith.constant 0 : index
    %c0_47 = arith.constant 0 : index
    %104 = vector.load %arg7[%c0_46, %c0_47] : memref<36x256xf32, #tpu.memory_space<vmem>>, vector<36x256xf32>
    %cst_48 = arith.constant dense<0.000000e+00> : vector<4x256xf32>
    %105 = tpu.matmul %71, %104, %cst_48 {dimension_numbers = #tpu.dot_dimension_numbers<[1], [0], [0], [1], [0, 0, 1, 1], [], []>} : vector<4x36xf32>, vector<36x256xf32>, vector<4x256xf32> -> vector<4x256xf32>
    %106 = vector.broadcast %72 : vector<4x1xf32> to vector<4x256xf32>
    %107 = arith.addf %105, %106 : vector<4x256xf32>
    %108 = arith.negf %107 : vector<4x256xf32>
    %109 = math.exp %108 : vector<4x256xf32>
    %cst_49 = arith.constant 1.000000e+00 : f32
    %110 = vector.broadcast %cst_49 : f32 to vector<4x256xf32>
    %111 = arith.addf %110, %109 : vector<4x256xf32>
    %112 = arith.divf %110, %111 : vector<4x256xf32>
    %113 = arith.mulf %107, %112 : vector<4x256xf32>
    %114 = arith.addf %113, %27 : vector<4x256xf32>
    %c0_50 = arith.constant 0 : index
    %c0_51 = arith.constant 0 : index
    %c0_52 = arith.constant 0 : index
    %115 = vector.load %arg6[%c0_50, %c0_51, %c0_52] : memref<1x4x256xf32, #tpu.memory_space<vmem>>, vector<1x4x256xf32>
    %116 = vector.shape_cast %115 : vector<1x4x256xf32> to vector<4x256xf32>
    %117 = vector.shape_cast %114 : vector<4x256xf32> to vector<1x4x256xf32>
    tpu.vector_store %arg6[%c0_50, %c0_51, %c0_52], %117 {strides = array<i32>} : memref<1x4x256xf32, #tpu.memory_space<vmem>>, vector<1x4x256xf32>,
    return
  }
  func.func @transform_0(%arg0: i32) -> (i32, i32, i32) {
    %c0_i32 = arith.constant 0 : i32
    %c0_i32_0 = arith.constant 0 : i32
    %c0_i32_1 = arith.constant 0 : i32
    return %arg0, %c0_i32, %c0_i32_0 : i32, i32, i32
  }
  func.func @transform_1(%arg0: i32) -> (i32, i32) {
    %c0_i32 = arith.constant 0 : i32
    %c0_i32_0 = arith.constant 0 : i32
    %c0_i32_1 = arith.constant 0 : i32
    return %c0_i32, %c0_i32_0 : i32, i32
  }
  func.func @transform_2(%arg0: i32) -> (i32, i32) {
    %c0_i32 = arith.constant 0 : i32
    %c0_i32_0 = arith.constant 0 : i32
    %c0_i32_1 = arith.constant 0 : i32
    return %c0_i32, %c0_i32_0 : i32, i32
  }
  func.func @transform_3(%arg0: i32) -> (i32, i32) {
    %c0_i32 = arith.constant 0 : i32
    %c0_i32_0 = arith.constant 0 : i32
    %c0_i32_1 = arith.constant 0 : i32
    return %c0_i32, %c0_i32_0 : i32, i32
  }
  func.func @transform_4(%arg0: i32) -> (i32, i32) {
    %c0_i32 = arith.constant 0 : i32
    %c0_i32_0 = arith.constant 0 : i32
    %c0_i32_1 = arith.constant 0 : i32
    return %c0_i32, %c0_i32_0 : i32, i32
  }
  func.func @transform_5(%arg0: i32) -> (i32, i32, i32) {
    %c0_i32 = arith.constant 0 : i32
    %c0_i32_0 = arith.constant 0 : i32
    %c0_i32_1 = arith.constant 0 : i32
    return %arg0, %c0_i32, %c0_i32_0 : i32, i32, i32
  }
}

</mosaic_0001>

<bundles_post_ra>
// kernel: qbw_residual.1
= control target key start
LH: loop header
LB: loop body
LE: loop exit
PB: predicated region body
PF: predicated region fallthrough
CT: control target
= control target key end

     0   :  { %s1081_s18 = smov 0   ;;  %s1336_s0 = inlined_call_operand.vmem [shape: f32[2,4,256], index: 0, kind: input, shape index: {}]   ;;  %s1337_s1 = inlined_call_operand.vmem [shape: f32[4,36], index: 1, kind: input, shape index: {}]   ;;  %s1338_s2 = inlined_call_operand.vmem [shape: f32[4,1], index: 2, kind: input, shape index: {}]   ;;  %s1339_s3 = inlined_call_operand.vmem [shape: f32[4,36], index: 3, kind: input, shape index: {}]   ;;  %s1340_s4 = inlined_call_operand.vmem [shape: f32[4,1], index: 4, kind: input, shape index: {}]   ;;  %s1341_s5 = inlined_call_operand.vmem [shape: f32[2,4,256], index: 5, kind: output, shape index: {}]  }
   0x1 LB: > { %s916_s19 = sadd.s32 4294967295, %s1033_s18   ;;  %p920_p0 = scmp.ge.s32.totalorder %s1033_s18, 1  ;;  %s1033_s18 = sphi %s1081_s18, %s15_s18  }
   0x2   : > { %p187_p1 = scmp.lt.s32.totalorder %s1033_s18, 3 }
   0x4   : > { %p188_p2 = pnand %p920_p0, %p187_p1 }
   0x5   : > { %p215_p3 = scmp.lt.s32.totalorder (!%p188_p2), %s916_s19, 1  ;;  %v225_v0 = vlaneseq (!%p188_p2)  ;;  %v1035_v1 = vmov (!%p188_p2), 0.0   ;;  %s1036_s24 = smov (!%p188_p2), 17   ;;  %vm273_vm4 = vcmask (!%p188_p2), 138240   ;;  %vm308_vm5 = vcmask (!%p188_p2), 15360  }
   0x6   : > { %191 = sbr.rel (%p188_p2) target bundleno = 1084 (0x43c), region = 40  ;;  %568 = vmatprep.mubr.f32.mxu0 (!%p188_p2), %v1035_v1  ;;  %832 = vmatprep.mubr.f32.mxu1 (!%p188_p2), %v1035_v1  ;;  %s1037_s25 = smov (!%p188_p2), 16   ;;  %vm338_vm6 = vcmask (!%p188_p2), 130048   ;;  %vm413_vm7 = vcmask (!%p188_p2), 261120   ;;  %vm382_vm8 = vcmask (!%p188_p2), 146432   ;;  %vm454_vm9 = vcmask (!%p188_p2), 277504  }
   0x7   : > { %v226_v2 = vand.u32 (!%p188_p2), 127, %v225_v0  ;;  %s1038_s26 = smov (!%p188_p2), 18   ;;  %s1039_s27 = smov (!%p188_p2), 2   ;;  %v266_v0 = vld [vmem:[%s1338_s2] sm:$0xf] (!%p188_p2)  ;;  %vm295_vm10 = vcmask (!%p188_p2), 1039360  }
   0x8   : > { %s1040_s28 = smov (!%p188_p2), 34   ;;  %s1041_s29 = smov (!%p188_p2), 32   ;;  %vm371_vm11 = vcmask (!%p188_p2), 908288   ;;  %vm325_vm12 = vcmask (!%p188_p2), 1031168   ;;  %vm443_vm13 = vcmask (!%p188_p2), 777216   ;;  %vm430_vm14 = vcmask (!%p188_p2), 785408  }
   0x9   : > { %v227_v3 = vadd.s32 (!%p188_p2), 128, %v226_v2  ;;  %v232_v4 = vand.u32 (!%p188_p2), 15, %v226_v2  ;;  %s1042_s30 = smov (!%p188_p2), 111   ;;  %s1043_s6 = smov (!%p188_p2), 127   ;;  %v1050_v2 = vmov (!%p188_p2), 0   ;;  %vm358_vm15 = vcmask (!%p188_p2), 916480  }
   0xa   : > { %s1044_s7 = smov (!%p188_p2), 126   ;;  %s1045_s8 = smov (!%p188_p2), 112   ;;  %1008 = vset.pattern.permute.xlu1 (!%p188_p2), %v1050_v2  ;;  %1009 = vset.pattern.permute.xlu0 (!%p188_p2), %v1050_v2 }
   0xb   : > { %v239_v6 = vand.u32 (!%p188_p2), 15, %v227_v3  ;;  %vm252_vm0 = vcmp.ne.s32.totalorder (!%p188_p2), %v232_v4, 0  ;;  %vm258_vm1 = vcmp.ne.s32.totalorder (!%p188_p2), %v232_v4, 15  ;;  %s1046_s9 = smov (!%p188_p2), 96   ;;  %s1047_s10 = smov (!%p188_p2), 95  }
   0xc   : > { %v1105_v8 = vsel (!%p188_p2), %vm252_vm0, 1.0, %v1035_v1  ;;  %v927_v9 = vsel (!%p188_p2), %vm258_vm1, 1.0, %v1035_v1  ;;  %s1048_s11 = smov (!%p188_p2), 110   ;;  %s1049_s12 = smov (!%p188_p2), 94   ;;  %vm402_vm0 = vcmask (!%p188_p2), 900096   ;;  %vm471_vm1 = vcmask (!%p188_p2), 769024  }
   0xd   : > { %s1343_s19 = smov (!%p215_p3, %s916_s19), 1  ;;  %vm253_vm2 = vcmp.ne.s32.totalorder %v239_v6, 0  ;;  %vm259_vm3 = vcmp.ne.s32.totalorder %v239_v6, 15 }
   0xe   : > { %s941_s20 = sshll.u32 %s1343_s19, 3  ;;  %v1107_v10 = vsel %vm253_vm2, 1.0, %v1035_v1  ;;  %v928_v11 = vsel %vm259_vm3, 1.0, %v1035_v1  ;;  %vm497_vm2 = vcmask 1043456   ;;  %vm493_vm3 = vcmask 293888  }
   0xf   : > { %s219_s23 = scalar_lea.vmem %s1336_s0, %s941_s20  ;;  %v983_v12 = vpack.i.bf16 %v1107_v10, %v1105_v8  ;;  %v993_v13 = vpack.i.bf16 %v928_v11, %v927_v9 }
  0x10   : > { %v1097_v5 = vld [vmem:[%s219_s23] sm:$0xff] }
  0x11   : > { %269 = vrot.lane.b32.xlu0 %v1097_v5, %s1036_s24  ;;  %v1103_v7 = vcombine.high %v1097_v5, %v1097_v5  ;;  %984 = vrot.lane.b32.xlu1 %v983_v12, %s1037_s25 }
  0x15   : > { %271 = vrot.lane.b32.xlu0 %v1103_v7, %s1036_s24  ;;  %989 = vrot.lane.b32.xlu1 %v993_v13, %s1039_s27 }
  0x19   : > { %994 = vrot.lane.b32.xlu0 %v993_v13, %s1038_s26  ;;  %999 = vrot.lane.b32.xlu1 %v983_v12, %s1041_s29  ;;  %s224_s26 = scalar_lea.vmem %s1341_s5, %s941_s20 }
  0x1d   : > { %1004 = vrot.lane.b32.xlu0 %v993_v13, %s1040_s28 }
  0x83   : > { %v270_v14 = vpop.permute.xlu0 %269  ;;  %v985_v21 = vpop.permute.xlu1 %984 }
  0x84   : > { %v1114_v15 = vsel %vm273_vm4, 0.0, %v270_v14  ;;  %v1132_v23 = vunpack.i.l.bf16 %v985_v21  ;;  %v1159_v37 = vunpack.i.h.bf16 %v985_v21 }
  0x85   : > { %v280_v16 = vmul.f32 %v1105_v8, %v1114_v15  ;;  %v286_v17 = vrot.slane %v1114_v15, 4  ;;  %365 = vrot.lane.b32.xlu0 %v1114_v15, %s1042_s30 }
  0x86   : > { %v343_v27 = vmul.f32 %v1132_v23, %v1114_v15  ;;  %v1177_v43 = vsel %vm338_vm6, %v1132_v23, %v1159_v37 }
  0x87   : > { %282 = vst [vmem:[#allocation2] sm:$0xf] %v280_v16  ;;  %289 = vrot.lane.b32.xlu1 %v286_v17, %s1043_s6  ;;  %v272_v18 = vpop.permute.xlu0 %271  ;;  %v990_v24 = vpop.permute.xlu1 %989 }
  0x88   : > { %v1125_v19 = vsel %vm273_vm4, %v270_v14, %v272_v18  ;;  %v1128_v20 = vsel %vm273_vm4, %v272_v18, 0.0  ;;  %v1136_v25 = vunpack.i.l.bf16 %v990_v24  ;;  %v349_v31 = vrot.slane %v343_v27, 4 }
  0x89   : > { %v281_v22 = vmul.f32 %v1107_v10, %v1125_v19  ;;  %v287_v26 = vrot.slane %v1125_v19, 4  ;;  %v1152_v34 = vunpack.i.h.bf16 %v990_v24  ;;  %v288_v35 = vrot.slane %v1128_v20, 4 }
  0x8a   : > { %v313_v28 = vmul.f32 %v1136_v25, %v1114_v15  ;;  %v344_v47 = vmul.f32 %v1177_v43, %v1125_v19  ;;  %v345_v49 = vmul.f32 %v1159_v37, %v1128_v20 }
  0x8b   : > { %283 = vst [vmem:[#allocation2 + $0x8] sm:$0xf] %v281_v22  ;;  %369 = vrot.lane.b32.xlu1 %v1128_v20, %s1042_s30  ;;  %v1000_v29 = vpop.permute.xlu1 %999  ;;  %v995_v33 = vpop.permute.xlu0 %994  ;;  %v1163_v38 = vsel %vm308_vm5, %v1136_v25, %v1152_v34  ;;  %v315_v39 = vmul.f32 %v1152_v34, %v1128_v20 }
  0x8c   : > { %v1144_v30 = vunpack.i.h.bf16 %v1000_v29  ;;  %319 = vrot.lane.b32.xlu0 %v313_v28, %s1044_s7  ;;  %v1156_v36 = vunpack.i.h.bf16 %v995_v33  ;;  %v1168_v40 = vunpack.i.l.bf16 %v1000_v29  ;;  %v314_v41 = vmul.f32 %v1163_v38, %v1125_v19 }
  0x8d   : > { %v1184_v45 = vunpack.i.l.bf16 %v995_v33  ;;  %v350_v50 = vrot.slane %v344_v47, 4  ;;  %v351_v52 = vrot.slane %v345_v49, 4 }
  0x8e   : > { %v420_v32 = vmul.f32 %v1144_v30, %v1128_v20  ;;  %v389_v42 = vmul.f32 %v1156_v36, %v1128_v20  ;;  %v1182_v44 = vsel %vm413_vm7, %v1168_v40, %v1144_v30  ;;  %v418_v56 = vmul.f32 %v1168_v40, %v1114_v15 }
  0x8f   : > { %291 = vrot.lane.b32.xlu1 %v287_v26, %s1043_s6  ;;  %v419_v48 = vmul.f32 %v1182_v44, %v1125_v19  ;;  %v387_v51 = vmul.f32 %v1184_v45, %v1114_v15  ;;  %v1200_v53 = vsel %vm382_vm8, %v1184_v45, %v1156_v36  ;;  %v1005_v54 = vpop.permute.xlu0 %1004 }
  0x90   : > { %367 = vrot.lane.b32.xlu0 %v1125_v19, %s1042_s30  ;;  %v395_v46 = vrot.slane %v389_v42, 4  ;;  %v388_v57 = vmul.f32 %v1200_v53, %v1125_v19  ;;  %v1208_v58 = vunpack.i.h.bf16 %v1005_v54  ;;  %v1210_v59 = vunpack.i.l.bf16 %v1005_v54 }
  0x91   : > { %v393_v55 = vrot.slane %v387_v51, 4 }
  0x92   : > { %v394_v60 = vrot.slane %v388_v57, 4  ;;  %v1218_v61 = vsel %vm454_vm9, %v1210_v59, %v1208_v58  ;;  %v461_v62 = vmul.f32 %v1208_v58, %v1128_v20  ;;  %v459_v1 = vmul.f32 %v1210_v59, %v1114_v15 }
  0x93   : > { %352 = vrot.lane.b32.xlu1 %v349_v31, %s1045_s8  ;;  %v460_v63 = vmul.f32 %v1218_v61, %v1125_v19 }
  0x94   : > { %293 = vrot.lane.b32.xlu0 %v288_v35, %s1043_s6 }
  0x97   : > { %428 = vrot.lane.b32.xlu1 %v420_v32, %s1046_s9 }
  0x98   : > { %323 = vrot.lane.b32.xlu0 %v315_v39, %s1044_s7 }
  0x9b   : > { %441 = vrot.lane.b32.xlu1 %v288_v35, %s1047_s10 }
  0x9c   : > { %439 = vrot.lane.b32.xlu0 %v287_v26, %s1047_s10 }
  0x9f   : > { %321 = vrot.lane.b32.xlu1 %v314_v41, %s1044_s7 }
  0xa0   : > { %426 = vrot.lane.b32.xlu0 %v419_v48, %s1046_s9 }
  0xa3   : > { %400 = vrot.lane.b32.xlu1 %v395_v46, %s1048_s11 }
  0xa4   : > { %356 = vrot.lane.b32.xlu0 %v351_v52, %s1045_s8 }
  0xa7   : > { %354 = vrot.lane.b32.xlu1 %v350_v50, %s1045_s8 }
  0xa8   : > { %424 = vrot.lane.b32.xlu0 %v418_v56, %s1046_s9 }
  0xab   : > { %396 = vrot.lane.b32.xlu1 %v393_v55, %s1048_s11 }
  0xac   : > { %398 = vrot.lane.b32.xlu0 %v394_v60, %s1048_s11 }
  0xaf   : > { %437 = vrot.lane.b32.xlu1 %v286_v17, %s1047_s10 }
  0xb0   : > { %467 = vrot.lane.b32.xlu0 %v460_v63, %s1049_s12 }
  0xb3   : > { %469 = vrot.lane.b32.xlu1 %v461_v62, %s1049_s12 }
  0xb4   : > { %465 = vrot.lane.b32.xlu0 %v459_v1, %s1049_s12 }
  0xb7   : > { %490 = vperm.xlu1 %1008, %v266_v0  }
  0xf7   : > { %v366_v6 = vpop.permute.xlu0 %365 }
  0xf9   : > { %v290_v3 = vpop.permute.xlu1 %289 }
  0xfd   : > { %v370_v4 = vpop.permute.xlu1 %369 }
  0xfe   : > { %v320_v12 = vpop.permute.xlu0 %319 }
 0x101   : > { %v292_v9 = vpop.permute.xlu1 %291 }
 0x102   : > { %v296_v11 = vsel %vm295_vm10, %v290_v3, %v292_v9  ;;  %v368_v14 = vpop.permute.xlu0 %367 }
 0x103   : > { %300 = vst [vmem:[#allocation2] sm:$0xf0] %v296_v11  ;;  %v372_v15 = vsel %vm371_vm11, %v366_v6, %v368_v14  ;;  %v373_v16 = vsel %vm371_vm11, %v368_v14, %v370_v4 }
 0x104   : > { %376 = vst [vmem:[#allocation2 + $0x20] sm:$0xf] %v372_v15  ;;  %377 = vst [vmem:[#allocation2 + $0x28] sm:$0xf] %v373_v16  ;;  %v265_v15 = vld [vmem:[%s1337_s1] sm:$0xf] }
 0x105   : > { %v353_v13 = vpop.permute.xlu1 %352 }
 0x106   : > { %v294_v18 = vpop.permute.xlu0 %293 }
 0x107   : > { %v297_v19 = vsel %vm295_vm10, %v292_v9, %v294_v18 }
 0x108   : > { %301 = vst [vmem:[#allocation2 + $0x8] sm:$0xf0] %v297_v19 }
 0x109   : > { %v429_v17 = vpop.permute.xlu1 %428 }
 0x10a   : > { %v324_v21 = vpop.permute.xlu0 %323  ;;  %v478_v60 = vld [vmem:[#allocation2] sm:$0xff] }
 0x10d   : > { %v442_v20 = vpop.permute.xlu1 %441 }
 0x10e   : > { %v440_v27 = vpop.permute.xlu0 %439 }
 0x10f   : > { %v445_v28 = vsel %vm443_vm13, %v440_v27, %v442_v20  ;;  %v479_v55 = vld [vmem:[#allocation2 + $0x8] sm:$0xff] }
 0x110   : > { %449 = vst [vmem:[#allocation2 + $0x38] sm:$0xf0] %v445_v28 }
 0x111   : > { %v322_v22 = vpop.permute.xlu1 %321 }
 0x112   : > { %v326_v24 = vsel %vm325_vm12, %v320_v12, %v322_v22  ;;  %v327_v26 = vsel %vm325_vm12, %v322_v22, %v324_v21  ;;  %v427_v31 = vpop.permute.xlu0 %426 }
 0x113   : > { %330 = vst [vmem:[#allocation2 + $0x10] sm:$0xf] %v326_v24  ;;  %331 = vst [vmem:[#allocation2 + $0x18] sm:$0xf] %v327_v26  ;;  %v432_v32 = vsel %vm430_vm14, %v427_v31, %v429_v17 }
 0x114   : > { %436 = vst [vmem:[#allocation2 + $0x38] sm:$0xf] %v432_v32 }
 0x115   : > { %v401_v29 = vpop.permute.xlu1 %400 }
 0x116   : > { %v357_v39 = vpop.permute.xlu0 %356 }
 0x119   : > { %v355_v33 = vpop.permute.xlu1 %354 }
 0x11a   : > { %v359_v35 = vsel %vm358_vm15, %v353_v13, %v355_v33  ;;  %v360_v41 = vsel %vm358_vm15, %v355_v33, %v357_v39  ;;  %v425_v46 = vpop.permute.xlu0 %424 }
 0x11b   : > { %363 = vst [vmem:[#allocation2 + $0x10] sm:$0xf0] %v359_v35  ;;  %364 = vst [vmem:[#allocation2 + $0x18] sm:$0xf0] %v360_v41  ;;  %v431_v47 = vsel %vm430_vm14, %v425_v46, %v427_v31  ;;  %v485_v3 = vld [vmem:[#allocation2 + $0x38] sm:$0xff] }
 0x11c   : > { %435 = vst [vmem:[#allocation2 + $0x30] sm:$0xf] %v431_v47 }
 0x11d   : > { %v397_v42 = vpop.permute.xlu1 %396 }
 0x11e   : > { %v399_v50 = vpop.permute.xlu0 %398 }
 0x11f   : > { %v403_v52 = vsel %vm402_vm0, %v397_v42, %v399_v50  ;;  %v404_v54 = vsel %vm402_vm0, %v399_v50, %v401_v29 }
 0x120   : > { %407 = vst [vmem:[#allocation2 + $0x20] sm:$0xf0] %v403_v52  ;;  %408 = vst [vmem:[#allocation2 + $0x28] sm:$0xf0] %v404_v54 }
 0x121   : > { %v438_v48 = vpop.permute.xlu1 %437 }
 0x122   : > { %v444_v49 = vsel %vm443_vm13, %v438_v48, %v440_v27  ;;  %v480_v51 = vld [vmem:[#allocation2 + $0x10] sm:$0xff]  ;;  %v481_v56 = vld [vmem:[#allocation2 + $0x18] sm:$0xff]  ;;  %v468_v0 = vpop.permute.xlu0 %467 }
 0x123   : > { %448 = vst [vmem:[#allocation2 + $0x30] sm:$0xf0] %v444_v49  ;;  %v943_v57 = vpack.c.bf16 %v481_v56, %v479_v55  ;;  %v945_v62 = vpack.c.bf16 %v480_v51, %v478_v60 }
 0x125   : > { %v470_v63 = vpop.permute.xlu1 %469  ;;  %944 = vmatprep.subr.bf16.mxu0 %v943_v57 }
 0x126   : > { %v473_v1 = vsel %vm471_vm1, %v468_v0, %v470_v63  ;;  %946 = vmatpush1.bf16.msra.mxu0 %v945_v62  ;;  %v466_v2 = vpop.permute.xlu0 %465 }
 0x127   : > { %477 = vst [vmem:[#allocation2 + $0x48] sm:$0xf] %v473_v1  ;;  %v472_v4 = vsel %vm471_vm1, %v466_v2, %v468_v0  ;;  %v483_v6 = vld [vmem:[#allocation2 + $0x28] sm:$0xff]  ;;  %v482_v9 = vld [vmem:[#allocation2 + $0x20] sm:$0xff] }
 0x128   : > { %476 = vst [vmem:[#allocation2 + $0x40] sm:$0xf] %v472_v4  ;;  %v947_v12 = vpack.c.bf16 %v485_v3, %v483_v6 }
 0x12a   : > { %v484_v11 = vld [vmem:[#allocation2 + $0x30] sm:$0xff]  ;;  %948 = vmatprep.subr.bf16.mxu0 %v947_v12 }
 0x12b   : > { %v949_v13 = vpack.c.bf16 %v484_v11, %v482_v9 }
 0x12d   : > { %950 = vmatpush1.bf16.msra.mxu0 %v949_v13 }
 0x12e   : > { %v487_v14 = vld [vmem:[#allocation2 + $0x48] sm:$0xf] }
 0x12f   : > { %929 = vmatprep.subr.msk.mxu0 %vm497_vm2, %v487_v14  ;;  %v486_v16 = vld [vmem:[#allocation2 + $0x40] sm:$0xf] }
 0x131   : > { %930 = vmatpush1.msk.msra.mxu0 %vm497_vm2, %v486_v16 }
 0x132   : > { %931 = vmatmul.mubr.msk.f32.vlgmr.msra.gmra.mrb[0].mxu0 %vm493_vm3, %v265_v15 }
 0x136   : > { %v491_v17 = vpop.permute.xlu1 %490 }
 0x205   : > { %v570_v18 = vpop.f32.mrb[0].mxu0 }
 0x206   : > { %v571_v19 = vadd.f32 %v570_v18, %v491_v17  ;;  %v572_v20 = vpop.f32.mrb[1].mxu0 }
 0x207   : > { %v573_v21 = vadd.f32 %v572_v20, %v491_v17 }
 0x208   : > { %v932_v22 = vmul.f32 -1.442695, %v571_v19 }
 0x209   : > { %v933_v24 = vmul.f32 -1.442695, %v573_v21 }
 0x20a   : > { %1011 = vpow2.f32 %v932_v22 }
 0x20b   : > { %1013 = vpow2.f32 %v933_v24 }
 0x214   : > { %v1012_v26 = vpop.eup %1011 }
 0x215   : > { %v1014_v27 = vpop.eup %1013  ;;  %v581_v28 = vadd.f32 1.0, %v1012_v26 }
 0x216   : > { %v582_v29 = vadd.f32 1.0, %v1014_v27 }
 0x217   : > { %1015 = vrcp.f32 %v581_v28 }
 0x218   : > { %1017 = vrcp.f32 %v582_v29 }
 0x221   : > { %v1016_v31 = vpop.eup %1015 }
 0x222   : > { %v1018_v32 = vpop.eup %1017  ;;  %v587_v33 = vmul.f32 %v1016_v31, %v571_v19 }
 0x223   : > { %v588_v35 = vmul.f32 %v1018_v32, %v573_v21 }
 0x224   : > { %593 = vrot.lane.b32.xlu0 %v587_v33, %s1036_s24 }
 0x225   : > { %595 = vrot.lane.b32.xlu1 %v588_v35, %s1036_s24 }
 0x296   : > { %v594_v39 = vpop.permute.xlu0 %593 }
 0x297   : > { %v601_v41 = vsel %vm273_vm4, 0.0, %v594_v39  ;;  %v596_v42 = vpop.permute.xlu1 %595 }
 0x298   : > { %v603_v46 = vmul.f32 %v1105_v8, %v601_v41  ;;  %v597_v47 = vsel %vm273_vm4, %v594_v39, %v596_v42  ;;  %v602_v48 = vsel %vm273_vm4, %v596_v42, 0.0  ;;  %663 = vrot.lane.b32.xlu1 %v601_v41, %s1042_s30  ;;  %v609_v50 = vrot.slane %v601_v41, 4 }
 0x299   : > { %v604_v49 = vmul.f32 %v1107_v10, %v597_v47  ;;  %667 = vrot.lane.b32.xlu0 %v602_v48, %s1042_s30  ;;  %v624_v51 = vmul.f32 %v1136_v25, %v601_v41  ;;  %v610_v8 = vrot.slane %v597_v47, 4  ;;  %v696_v52 = vmul.f32 %v1168_v40, %v601_v41 }
 0x29a   : > { %605 = vst [vmem:[#allocation2] sm:$0xf] %v603_v46  ;;  %v625_v10 = vmul.f32 %v597_v47, %v1163_v38  ;;  %v611_v54 = vrot.slane %v602_v48, 4  ;;  %v698_v55 = vmul.f32 %v1144_v30, %v602_v48  ;;  %v626_v25 = vmul.f32 %v1152_v34, %v602_v48 }
 0x29b   : > { %606 = vst [vmem:[#allocation2 + $0x8] sm:$0xf] %v604_v49  ;;  %v642_v56 = vmul.f32 %v1132_v23, %v601_v41  ;;  %v697_v38 = vmul.f32 %v597_v47, %v1182_v44  ;;  %v675_v57 = vmul.f32 %v1184_v45, %v601_v41  ;;  %v644_v30 = vmul.f32 %v1159_v37, %v602_v48 }
 0x29c   : > { %665 = vrot.lane.b32.xlu1 %v597_v47, %s1042_s30  ;;  %v643_v34 = vmul.f32 %v597_v47, %v1177_v43  ;;  %v676_v62 = vmul.f32 %v597_v47, %v1200_v53  ;;  %v677_v63 = vmul.f32 %v1156_v36, %v602_v48  ;;  %v727_v37 = vmul.f32 %v597_v47, %v1218_v61  ;;  %v590_v53 = vld [vmem:[%s1340_s4] sm:$0xf] }
 0x29d   : > { %612 = vrot.lane.b32.xlu0 %v609_v50, %s1043_s6  ;;  %v648_v40 = vrot.slane %v642_v56, 4  ;;  %v681_v60 = vrot.slane %v675_v57, 4  ;;  %v650_v23 = vrot.slane %v644_v30, 4  ;;  %v726_v43 = vmul.f32 %v1210_v59, %v601_v41 }
 0x29e   : > { %v649_v44 = vrot.slane %v643_v34, 4  ;;  %v682_v45 = vrot.slane %v676_v62, 4  ;;  %v683_v0 = vrot.slane %v677_v63, 4  ;;  %v728_v36 = vmul.f32 %v1208_v58, %v602_v48  ;;  %v589_v62 = vld [vmem:[%s1339_s3] sm:$0xf] }
 0x2a0   : > { %630 = vrot.lane.b32.xlu1 %v624_v51, %s1044_s7 }
 0x2a1   : > { %614 = vrot.lane.b32.xlu0 %v610_v8, %s1043_s6 }
 0x2a4   : > { %702 = vrot.lane.b32.xlu1 %v696_v52, %s1046_s9 }
 0x2a5   : > { %632 = vrot.lane.b32.xlu0 %v625_v10, %s1044_s7 }
 0x2a8   : > { %616 = vrot.lane.b32.xlu1 %v611_v54, %s1043_s6 }
 0x2a9   : > { %706 = vrot.lane.b32.xlu0 %v698_v55, %s1046_s9 }
 0x2ac   : > { %634 = vrot.lane.b32.xlu1 %v626_v25, %s1044_s7 }
 0x2ad   : > { %718 = vrot.lane.b32.xlu0 %v611_v54, %s1047_s10 }
 0x2b0   : > { %704 = vrot.lane.b32.xlu1 %v697_v38, %s1046_s9 }
 0x2b1   : > { %651 = vrot.lane.b32.xlu0 %v648_v40, %s1045_s8 }
 0x2b4   : > { %716 = vrot.lane.b32.xlu1 %v610_v8, %s1047_s10 }
 0x2b5   : > { %684 = vrot.lane.b32.xlu0 %v681_v60, %s1048_s11 }
 0x2b8   : > { %655 = vrot.lane.b32.xlu1 %v650_v23, %s1045_s8 }
 0x2b9   : > { %653 = vrot.lane.b32.xlu0 %v649_v44, %s1045_s8 }
 0x2bc   : > { %686 = vrot.lane.b32.xlu1 %v682_v45, %s1048_s11 }
 0x2bd   : > { %688 = vrot.lane.b32.xlu0 %v683_v0, %s1048_s11 }
 0x2c0   : > { %734 = vrot.lane.b32.xlu1 %v727_v37, %s1049_s12 }
 0x2c1   : > { %714 = vrot.lane.b32.xlu0 %v609_v50, %s1047_s10 }
 0x2c4   : > { %732 = vrot.lane.b32.xlu1 %v726_v43, %s1049_s12 }
 0x2c5   : > { %736 = vrot.lane.b32.xlu0 %v728_v36, %s1049_s12 }
 0x2c9   : > { %756 = vperm.xlu0 %1009, %v590_v53  }
 0x30a   : > { %v664_v1 = vpop.permute.xlu1 %663 }
 0x30b   : > { %v668_v2 = vpop.permute.xlu0 %667 }
 0x30e   : > { %v666_v61 = vpop.permute.xlu1 %665 }
 0x30f   : > { %v669_v3 = vsel %vm371_vm11, %v664_v1, %v666_v61  ;;  %v670_v4 = vsel %vm371_vm11, %v666_v61, %v668_v2  ;;  %v613_v6 = vpop.permute.xlu0 %612 }
 0x310   : > { %673 = vst [vmem:[#allocation2 + $0x20] sm:$0xf] %v669_v3  ;;  %674 = vst [vmem:[#allocation2 + $0x28] sm:$0xf] %v670_v4 }
 0x312   : > { %v631_v58 = vpop.permute.xlu1 %630 }
 0x313   : > { %v615_v59 = vpop.permute.xlu0 %614 }
 0x314   : > { %v618_v9 = vsel %vm295_vm10, %v613_v6, %v615_v59 }
 0x315   : > { %622 = vst [vmem:[#allocation2] sm:$0xf0] %v618_v9 }
 0x316   : > { %v703_v11 = vpop.permute.xlu1 %702 }
 0x317   : > { %v633_v12 = vpop.permute.xlu0 %632 }
 0x318   : > { %v636_v13 = vsel %vm325_vm12, %v631_v58, %v633_v12 }
 0x319   : > { %640 = vst [vmem:[#allocation2 + $0x10] sm:$0xf] %v636_v13 }
 0x31a   : > { %v617_v14 = vpop.permute.xlu1 %616 }
 0x31b   : > { %v619_v15 = vsel %vm295_vm10, %v615_v59, %v617_v14  ;;  %v707_v16 = vpop.permute.xlu0 %706 }
 0x31c   : > { %623 = vst [vmem:[#allocation2 + $0x8] sm:$0xf0] %v619_v15  ;;  %v744_v48 = vld [vmem:[#allocation2] sm:$0xff] }
 0x31e   : > { %v635_v17 = vpop.permute.xlu1 %634 }
 0x31f   : > { %v637_v18 = vsel %vm325_vm12, %v633_v12, %v635_v17  ;;  %v719_v19 = vpop.permute.xlu0 %718 }
 0x320   : > { %641 = vst [vmem:[#allocation2 + $0x18] sm:$0xf] %v637_v18 }
 0x322   : > { %v705_v20 = vpop.permute.xlu1 %704 }
 0x323   : > { %v708_v21 = vsel %vm430_vm14, %v703_v11, %v705_v20  ;;  %v709_v22 = vsel %vm430_vm14, %v705_v20, %v707_v16  ;;  %v652_v24 = vpop.permute.xlu0 %651  ;;  %v745_v50 = vld [vmem:[#allocation2 + $0x8] sm:$0xff] }
 0x324   : > { %712 = vst [vmem:[#allocation2 + $0x30] sm:$0xf] %v708_v21  ;;  %713 = vst [vmem:[#allocation2 + $0x38] sm:$0xf] %v709_v22 }
 0x326   : > { %v717_v26 = vpop.permute.xlu1 %716 }
 0x327   : > { %v721_v27 = vsel %vm443_vm13, %v717_v26, %v719_v19  ;;  %v685_v28 = vpop.permute.xlu0 %684 }
 0x328   : > { %725 = vst [vmem:[#allocation2 + $0x38] sm:$0xf0] %v721_v27 }
 0x32a   : > { %v656_v29 = vpop.permute.xlu1 %655 }
 0x32b   : > { %v654_v31 = vpop.permute.xlu0 %653 }
 0x32c   : > { %v657_v32 = vsel %vm358_vm15, %v652_v24, %v654_v31  ;;  %v658_v33 = vsel %vm358_vm15, %v654_v31, %v656_v29 }
 0x32d   : > { %661 = vst [vmem:[#allocation2 + $0x10] sm:$0xf0] %v657_v32  ;;  %662 = vst [vmem:[#allocation2 + $0x18] sm:$0xf0] %v658_v33 }
 0x32e   : > { %v687_v35 = vpop.permute.xlu1 %686 }
 0x32f   : > { %v690_v39 = vsel %vm402_vm0, %v685_v28, %v687_v35  ;;  %v689_v41 = vpop.permute.xlu0 %688  ;;  %v751_v40 = vld [vmem:[#allocation2 + $0x38] sm:$0xff] }
 0x330   : > { %694 = vst [vmem:[#allocation2 + $0x20] sm:$0xf0] %v690_v39  ;;  %v691_v42 = vsel %vm402_vm0, %v687_v35, %v689_v41 }
 0x331   : > { %695 = vst [vmem:[#allocation2 + $0x28] sm:$0xf0] %v691_v42 }
 0x332   : > { %v735_v46 = vpop.permute.xlu1 %734 }
 0x333   : > { %v715_v47 = vpop.permute.xlu0 %714 }
 0x334   : > { %v720_v49 = vsel %vm443_vm13, %v715_v47, %v717_v26  ;;  %v747_v51 = vld [vmem:[#allocation2 + $0x18] sm:$0xff]  ;;  %v746_v8 = vld [vmem:[#allocation2 + $0x10] sm:$0xff] }
 0x335   : > { %724 = vst [vmem:[#allocation2 + $0x30] sm:$0xf0] %v720_v49  ;;  %v951_v52 = vpack.c.bf16 %v747_v51, %v745_v50  ;;  %v953_v10 = vpack.c.bf16 %v746_v8, %v744_v48 }
 0x336   : > { %v733_v54 = vpop.permute.xlu1 %732 }
 0x337   : > { %v738_v55 = vsel %vm471_vm1, %v733_v54, %v735_v46  ;;  %952 = vmatprep.subr.bf16.mxu1 %v951_v52  ;;  %v737_v25 = vpop.permute.xlu0 %736  ;;  %v748_v30 = vld [vmem:[#allocation2 + $0x20] sm:$0xff] }
 0x338   : > { %742 = vst [vmem:[#allocation2 + $0x40] sm:$0xf] %v738_v55  ;;  %v739_v56 = vsel %vm471_vm1, %v735_v46, %v737_v25  ;;  %954 = vmatpush1.bf16.msra.mxu1 %v953_v10  ;;  %v749_v38 = vld [vmem:[#allocation2 + $0x28] sm:$0xff] }
 0x339   : > { %743 = vst [vmem:[#allocation2 + $0x48] sm:$0xf] %v739_v56  ;;  %v955_v57 = vpack.c.bf16 %v751_v40, %v749_v38 }
 0x33b   : > { %956 = vmatprep.subr.bf16.mxu1 %v955_v57 }
 0x33c   : > { %v750_v60 = vld [vmem:[#allocation2 + $0x30] sm:$0xff] }
 0x33d   : > { %v957_v34 = vpack.c.bf16 %v750_v60, %v748_v30 }
 0x33f   : > { %958 = vmatpush1.bf16.msra.mxu1 %v957_v34  ;;  %v752_v44 = vld [vmem:[#allocation2 + $0x40] sm:$0xf] }
 0x340   : > { %v753_v23 = vld [vmem:[#allocation2 + $0x48] sm:$0xf] }
 0x341   : > { %934 = vmatprep.subr.msk.mxu1 %vm497_vm2, %v753_v23 }
 0x343   : > { %935 = vmatpush1.msk.msra.mxu1 %vm497_vm2, %v752_v44 }
 0x344   : > { %936 = vmatmul.mubr.msk.f32.vlgmr.msra.gmra.mrb[0].mxu1 %vm493_vm3, %v589_v62 }
 0x348   : > { %v757_v63 = vpop.permute.xlu0 %756 }
 0x417   : > { %v834_v45 = vpop.f32.mrb[0].mxu1 }
 0x418   : > { %v835_v0 = vadd.f32 %v834_v45, %v757_v63  ;;  %v836_v37 = vpop.f32.mrb[1].mxu1 }
 0x419   : > { %v837_v43 = vadd.f32 %v836_v37, %v757_v63 }
 0x41a   : > { %v937_v36 = vmul.f32 -1.442695, %v835_v0 }
 0x41b   : > { %v938_v53 = vmul.f32 -1.442695, %v837_v43 }
 0x41c   : > { %1019 = vpow2.f32 %v937_v36 }
 0x41d   : > { %1021 = vpow2.f32 %v938_v53 }
 0x426   : > { %v1020_v1 = vpop.eup %1019 }
 0x427   : > { %v1022_v2 = vpop.eup %1021  ;;  %v845_v61 = vadd.f32 1.0, %v1020_v1 }
 0x428   : > { %v846_v3 = vadd.f32 1.0, %v1022_v2 }
 0x429   : > { %1023 = vrcp.f32 %v845_v61 }
 0x42a   : > { %1025 = vrcp.f32 %v846_v3 }
 0x433   : > { %v1024_v4 = vpop.eup %1023 }
 0x434   : > { %v1026_v6 = vpop.eup %1025  ;;  %v851_v58 = vmul.f32 %v1024_v4, %v835_v0 }
 0x435   : > { %v852_v59 = vmul.f32 %v1026_v6, %v837_v43 }
 0x436   : > { %v854_v9 = vadd.f32 %v851_v58, %v1097_v5 }
 0x437   : > { %v855_v11 = vadd.f32 %v852_v59, %v1103_v7 }
 0x439   : > { %v858_v12 = vcombine.low %v854_v9, %v855_v11 }
 0x43b   : > { %860 = vst [vmem:[%s224_s26] sm:$0xff] %v858_v12 }
 0x43c PF: > { %s15_s18 = sadd.s32 1, %s1033_s18  }
 0x43d   : > { %p12_p4 = scmp.ge.s32.totalorder %s15_s18, 4  }
 0x43f   :  { %14 = sbr.rel (!%p12_p4) target bundleno = 1 (0x1), region = 70 }

</bundles_post_ra>
